<compile_context>
chip_gen: v6e
topology: v6e:2x2x1
jax: 0.10.0
libtpu: 0.0.40
codegen_flags: <defaults>
</compile_context>

<pallas_src>
import functools

import jax
import jax.numpy as jnp
from jax.experimental import pallas as pl
from jax.experimental.pallas import tpu as pltpu

_LANES = 128   # common padded lane width for hidden/class dims (all <= 128)


def _round_up(x, m):
    return ((x + m - 1) // m) * m


def _dndt_kernel(x_ref, w1_ref, w_ref, b_ref, out_ref, *, num_classes):
    # x tile: (bb, input_dim) f32, streamed at native width; cast to bf16 for
    # the MXU (accumulation stays f32 via preferred_element_type).
    x = x_ref[...].astype(jnp.bfloat16)

    # Layer 1: W1 packed (input_dim, 128); padded out-lanes are zero, and
    # relu(0 + 0) = 0 keeps them exactly zero through the rest of the network.
    h = jnp.dot(x, w1_ref[...], preferred_element_type=jnp.float32)
    h = jnp.maximum(h + b_ref[0:1, :], 0.0)

    # Layers 2 & 3 (padded 128x128 weight tiles, zero-padded rows/cols).
    h = jnp.dot(h.astype(jnp.bfloat16), w_ref[0], preferred_element_type=jnp.float32)
    h = jnp.maximum(h + b_ref[1:2, :], 0.0)
    h = jnp.dot(h.astype(jnp.bfloat16), w_ref[1], preferred_element_type=jnp.float32)
    h = jnp.maximum(h + b_ref[2:3, :], 0.0)

    # Layer 4: logits (bb, 128); only the first num_classes lanes are real.
    logits = (jnp.dot(h.astype(jnp.bfloat16), w_ref[2],
                      preferred_element_type=jnp.float32) + b_ref[3:4, :])

    # Mask padded class lanes to a huge negative so exp() makes them exactly 0;
    # this keeps the store lane-dense (full 128-lane vst) while the softmax is
    # numerically restricted to the real classes.
    lane = jax.lax.broadcasted_iota(jnp.int32, logits.shape, 1)
    logits = jnp.where(lane < num_classes, logits, -1e30)

    # Softmax over dim=1 (classes), f32 throughout, EXACT normalization so rows
    # sum to 1 to f32 rounding.
    m = jnp.max(logits, axis=1, keepdims=True)
    e = jnp.exp(logits - m)
    denom = jnp.sum(e, axis=1, keepdims=True)
    out_ref[...] = (e / denom).astype(out_ref.dtype)


def pack_params(params):
    """One-time parameter prep (hoisted out of the per-call path)."""
    w = [params[f"w{i}"] for i in range(1, 5)]
    b = [params[f"b{i}"] for i in range(1, 5)]
    input_dim = w[0].shape[0]
    dims = [input_dim] + [wi.shape[1] for wi in w]      # [in, 10, 20, 10, C]
    H = _LANES
    assert max(dims[1:]) <= H, "hidden/class dims must be <= 128"

    w1p = jnp.zeros((input_dim, H), jnp.bfloat16)
    w1p = w1p.at[:, : dims[1]].set(w[0].astype(jnp.bfloat16))

    w_rest = jnp.zeros((3, H, H), jnp.bfloat16)
    for i in range(3):
        w_rest = w_rest.at[i, : dims[i + 1], : dims[i + 2]].set(
            w[i + 1].astype(jnp.bfloat16))

    b_packed = jnp.zeros((4, H), jnp.float32)
    for i in range(4):
        b_packed = b_packed.at[i, : dims[i + 1]].set(
            b[i].reshape(-1).astype(jnp.float32))

    return {"w1": w1p, "w_rest": w_rest, "b": b_packed,
            "input_dim": input_dim, "num_classes": dims[-1]}


def dndt_forward(x, packed, *, block_b=4096, interpret=False):
    """x: (B, input_dim) f32. packed: output of pack_params."""
    B, input_dim = x.shape
    assert input_dim == packed["input_dim"]
    num_classes = packed["num_classes"]
    H = packed["b"].shape[1]   # 128

    # --- batch tile sizing ----------------------------------------------------
    # Per-row VMEM: x block (lane-padded, double-buffered) + out block (double-
    # buffered) + ~3 live (bb, 128) f32 intermediates.  Keep the working set
    # around half of the 32 MiB scoped budget.
    d_lanes = max(_round_up(input_dim, _LANES), _LANES)
    bytes_per_row = 4 * (2 * d_lanes + 2 * H + 3 * H)
    bb_cap = max(8, (16 * 1024 * 1024 // bytes_per_row) // 8 * 8)
    # Cap at ~half the batch so grid >= 2 steps -> both v7x TensorCores busy.
    bb_half = _round_up(max(1, -(-B // 2)), 8)
    bb = max(8, min(block_b, bb_cap, bb_half))

    Bp = _round_up(B, bb)
    xp = x if Bp == B else jnp.pad(x, ((0, Bp - B), (0, 0)))
    grid = (Bp // bb,)

    kernel = functools.partial(_dndt_kernel, num_classes=num_classes)

    out = pl.pallas_call(
        kernel,
        out_shape=jax.ShapeDtypeStruct((Bp, H), jnp.float32),
        grid_spec=pltpu.PrefetchScalarGridSpec(
            num_scalar_prefetch=0,
            grid=grid,
            in_specs=[
                # x stream: native (bb, input_dim) width, tiled along batch.
                pl.BlockSpec((bb, input_dim), lambda i: (i, 0)),
                # Grid-invariant packed weights / biases: constant block index
                # -> DMA'd once, VMEM-resident for the whole grid.
                pl.BlockSpec((input_dim, H), lambda i: (0, 0)),
                pl.BlockSpec((3, H, H), lambda i: (0, 0, 0)),
                pl.BlockSpec((4, H), lambda i: (0, 0)),
            ],
            # Lane-dense padded output block (full vst / contiguous writeback);
            # real class lanes are sliced out in the wrapper below.
            out_specs=pl.BlockSpec((bb, H), lambda i: (i, 0)),
        ),
        compiler_params=pltpu.CompilerParams(
            dimension_semantics=("parallel",),   # shard batch grid across TCs
            vmem_limit_bytes=32 * 1024 * 1024,   # safe on v7x (64 MiB physical)
        ),
        interpret=interpret,
    )(xp, packed["w1"], packed["w_rest"], packed["b"])

    return out[:B, :num_classes]


def init_params(key, input_dim, num_classes, hidden_units=(10, 20, 10)):
    """Deterministic synthetic init (PyTorch-style uniform fan-in bounds)."""
    dims = [input_dim, *hidden_units, num_classes]
    params = {}
    for idx in range(4):
        fan_in, fan_out = dims[idx], dims[idx + 1]
        key, kw, kb = jax.random.split(key, 3)
        bound = 1.0 / jnp.sqrt(jnp.float32(fan_in))
        # stored as (in, out) — transposed vs torch's (out, in)
        params[f"w{idx+1}"] = jax.random.uniform(
            kw, (fan_in, fan_out), jnp.float32, -bound, bound)
        params[f"b{idx+1}"] = jax.random.uniform(
            kb, (1, fan_out), jnp.float32, -bound, bound)
    return params


def dndt_reference(x, params):
    h = x
    for idx in range(1, 4):
        h = jnp.maximum(h @ params[f"w{idx}"] + params[f"b{idx}"], 0.0)
    logits = h @ params["w4"] + params["b4"]
    return jax.nn.softmax(logits, axis=1)


if __name__ == "__main__":
    key = jax.random.PRNGKey(0)
    B, input_dim, num_classes = 64, 16, 4

    key, kx, kp = jax.random.split(key, 3)
    x = jax.random.normal(kx, (B, input_dim), jnp.float32)
    params = init_params(kp, input_dim, num_classes)
    packed = pack_params(params)          # one-time parameter prep (hoisted)

    out = jax.block_until_ready(dndt_forward(x, packed))
    ref = dndt_reference(x, params)

    assert out.shape == (B, num_classes)
    # bf16 MXU operands -> ~1e-2 relative error vs the f32 reference.
    assert jnp.allclose(out, ref, atol=2e-2, rtol=2e-2)
    # Exact softmax normalization -> rows sum to 1 to f32 rounding.
    assert jnp.allclose(jnp.sum(out, axis=1), jnp.ones((B,)), atol=1e-3)

    print("KERNEL_OK")
</pallas_src>

<mosaic_0001>
module attributes {stable_mosaic.version = 11 : i64} {
  func.func @_dndt_kernel(%arg0: i32, %arg1: memref<32x16xf32, #tpu.memory_space<vmem>>, %arg2: memref<16x128xbf16, #tpu.memory_space<vmem>>, %arg3: memref<3x128x128xbf16, #tpu.memory_space<vmem>>, %arg4: memref<4x128xf32, #tpu.memory_space<vmem>>, %arg5: memref<32x128xf32, #tpu.memory_space<vmem>>) attributes {dimension_semantics = [#tpu.dimension_semantics<parallel>], iteration_bounds = array<i64: 2>, scalar_prefetch = 0 : i64, scratch_operands = 0 : i64, tpu.core_type = #tpu.core_type<tc>, window_params = [{transform_indices = @transform_0, window_bounds = array<i64: 32, 16>}, {pipeline_mode = #tpu.pipeline_mode<synchronous>, transform_indices = @transform_1, window_bounds = array<i64: 16, 128>}, {pipeline_mode = #tpu.pipeline_mode<synchronous>, transform_indices = @transform_2, window_bounds = array<i64: 3, 128, 128>}, {pipeline_mode = #tpu.pipeline_mode<synchronous>, transform_indices = @transform_3, window_bounds = array<i64: 4, 128>}, {transform_indices = @transform_4, window_bounds = array<i64: 32, 128>}]} {
    %c0 = arith.constant 0 : index
    %c0_0 = arith.constant 0 : index
    %0 = vector.load %arg1[%c0, %c0_0] : memref<32x16xf32, #tpu.memory_space<vmem>>, vector<32x16xf32>
    %1 = arith.truncf %0 : vector<32x16xf32> to vector<32x16xbf16>
    %c0_1 = arith.constant 0 : index
    %c0_2 = arith.constant 0 : index
    %2 = vector.load %arg2[%c0_1, %c0_2] : memref<16x128xbf16, #tpu.memory_space<vmem>>, vector<16x128xbf16>
    %cst = arith.constant dense<0.000000e+00> : vector<32x128xf32>
    %3 = tpu.matmul %1, %2, %cst {dimension_numbers = #tpu.dot_dimension_numbers<[1], [0], [0], [1], [0, 0, 1, 1], [], []>} : vector<32x16xbf16>, vector<16x128xbf16>, vector<32x128xf32> -> vector<32x128xf32>
    %c0_3 = arith.constant 0 : index
    %c0_4 = arith.constant 0 : index
    %4 = vector.load %arg4[%c0_3, %c0_4] : memref<4x128xf32, #tpu.memory_space<vmem>>, vector<1x128xf32>
    %5 = vector.broadcast %4 : vector<1x128xf32> to vector<32x128xf32>
    %6 = arith.addf %3, %5 : vector<32x128xf32>
    %cst_5 = arith.constant 0.000000e+00 : f32
    %7 = vector.broadcast %cst_5 : f32 to vector<32x128xf32>
    %8 = arith.maximumf %6, %7 : vector<32x128xf32>
    %9 = arith.truncf %8 : vector<32x128xf32> to vector<32x128xbf16>
    %c0_6 = arith.constant 0 : index
    %c0_7 = arith.constant 0 : index
    %c0_8 = arith.constant 0 : index
    %10 = vector.load %arg3[%c0_6, %c0_7, %c0_8] : memref<3x128x128xbf16, #tpu.memory_space<vmem>>, vector<1x128x128xbf16>
    %11 = vector.shape_cast %10 : vector<1x128x128xbf16> to vector<128x128xbf16>
    %cst_9 = arith.constant dense<0.000000e+00> : vector<32x128xf32>
    %12 = tpu.matmul %9, %11, %cst_9 {dimension_numbers = #tpu.dot_dimension_numbers<[1], [0], [0], [1], [0, 0, 1, 1], [], []>} : vector<32x128xbf16>, vector<128x128xbf16>, vector<32x128xf32> -> vector<32x128xf32>
    %c1 = arith.constant 1 : index
    %c0_10 = arith.constant 0 : index
    %13 = vector.load %arg4[%c1, %c0_10] : memref<4x128xf32, #tpu.memory_space<vmem>>, vector<1x128xf32>
    %14 = vector.broadcast %13 : vector<1x128xf32> to vector<32x128xf32>
    %15 = arith.addf %12, %14 : vector<32x128xf32>
    %cst_11 = arith.constant 0.000000e+00 : f32
    %16 = vector.broadcast %cst_11 : f32 to vector<32x128xf32>
    %17 = arith.maximumf %15, %16 : vector<32x128xf32>
    %18 = arith.truncf %17 : vector<32x128xf32> to vector<32x128xbf16>
    %c1_12 = arith.constant 1 : index
    %c0_13 = arith.constant 0 : index
    %c0_14 = arith.constant 0 : index
    %19 = vector.load %arg3[%c1_12, %c0_13, %c0_14] : memref<3x128x128xbf16, #tpu.memory_space<vmem>>, vector<1x128x128xbf16>
    %20 = vector.shape_cast %19 : vector<1x128x128xbf16> to vector<128x128xbf16>
    %cst_15 = arith.constant dense<0.000000e+00> : vector<32x128xf32>
    %21 = tpu.matmul %18, %20, %cst_15 {dimension_numbers = #tpu.dot_dimension_numbers<[1], [0], [0], [1], [0, 0, 1, 1], [], []>} : vector<32x128xbf16>, vector<128x128xbf16>, vector<32x128xf32> -> vector<32x128xf32>
    %c2 = arith.constant 2 : index
    %c0_16 = arith.constant 0 : index
    %22 = vector.load %arg4[%c2, %c0_16] : memref<4x128xf32, #tpu.memory_space<vmem>>, vector<1x128xf32>
    %23 = vector.broadcast %22 : vector<1x128xf32> to vector<32x128xf32>
    %24 = arith.addf %21, %23 : vector<32x128xf32>
    %cst_17 = arith.constant 0.000000e+00 : f32
    %25 = vector.broadcast %cst_17 : f32 to vector<32x128xf32>
    %26 = arith.maximumf %24, %25 : vector<32x128xf32>
    %27 = arith.truncf %26 : vector<32x128xf32> to vector<32x128xbf16>
    %c2_18 = arith.constant 2 : index
    %c0_19 = arith.constant 0 : index
    %c0_20 = arith.constant 0 : index
    %28 = vector.load %arg3[%c2_18, %c0_19, %c0_20] : memref<3x128x128xbf16, #tpu.memory_space<vmem>>, vector<1x128x128xbf16>
    %29 = vector.shape_cast %28 : vector<1x128x128xbf16> to vector<128x128xbf16>
    %cst_21 = arith.constant dense<0.000000e+00> : vector<32x128xf32>
    %30 = tpu.matmul %27, %29, %cst_21 {dimension_numbers = #tpu.dot_dimension_numbers<[1], [0], [0], [1], [0, 0, 1, 1], [], []>} : vector<32x128xbf16>, vector<128x128xbf16>, vector<32x128xf32> -> vector<32x128xf32>
    %c3 = arith.constant 3 : index
    %c0_22 = arith.constant 0 : index
    %31 = vector.load %arg4[%c3, %c0_22] : memref<4x128xf32, #tpu.memory_space<vmem>>, vector<1x128xf32>
    %32 = vector.broadcast %31 : vector<1x128xf32> to vector<32x128xf32>
    %33 = arith.addf %30, %32 : vector<32x128xf32>
    %34 = tpu.iota {dimensions = array<i32: 1>} : vector<32x128xi32>
    %c4_i32 = arith.constant 4 : i32
    %35 = vector.broadcast %c4_i32 : i32 to vector<32x128xi32>
    %36 = arith.cmpi slt, %34, %35 : vector<32x128xi32>
    %cst_23 = arith.constant -1.000000e+30 : f32
    %37 = vector.broadcast %cst_23 : f32 to vector<32x128xf32>
    %38 = arith.select %36, %33, %37 : vector<32x128xi1>, vector<32x128xf32>
    %cst_24 = arith.constant dense<0xFF800000> : vector<32xf32>
    %39 = vector.multi_reduction <maximumf>, %38, %cst_24 [1] : vector<32x128xf32> to vector<32xf32>
    %40 = vector.shape_cast %39 : vector<32xf32> to vector<32x1xf32>
    %41 = vector.broadcast %40 : vector<32x1xf32> to vector<32x128xf32>
    %42 = arith.subf %38, %41 : vector<32x128xf32>
    %43 = math.exp %42 : vector<32x128xf32>
    %cst_25 = arith.constant dense<0.000000e+00> : vector<32xf32>
    %44 = vector.multi_reduction <add>, %43, %cst_25 [1] : vector<32x128xf32> to vector<32xf32>
    %45 = vector.shape_cast %44 : vector<32xf32> to vector<32x1xf32>
    %46 = vector.broadcast %45 : vector<32x1xf32> to vector<32x128xf32>
    %47 = arith.divf %43, %46 : vector<32x128xf32>
    %c0_26 = arith.constant 0 : index
    %c0_27 = arith.constant 0 : index
    %48 = vector.load %arg5[%c0_26, %c0_27] : memref<32x128xf32, #tpu.memory_space<vmem>>, vector<32x128xf32>
    tpu.vector_store %arg5[%c0_26, %c0_27], %47 {strides = array<i32>} : memref<32x128xf32, #tpu.memory_space<vmem>>, vector<32x128xf32>,
    return
  }
  func.func @transform_0(%arg0: i32) -> (i32, i32) {
    %c0_i32 = arith.constant 0 : i32
    %c0_i32_0 = arith.constant 0 : i32
    return %arg0, %c0_i32 : i32, i32
  }
  func.func @transform_1(%arg0: i32) -> (i32, i32) {
    %c0_i32 = arith.constant 0 : i32
    %c0_i32_0 = arith.constant 0 : i32
    %c0_i32_1 = arith.constant 0 : i32
    return %c0_i32, %c0_i32_0 : i32, i32
  }
  func.func @transform_2(%arg0: i32) -> (i32, i32, i32) {
    %c0_i32 = arith.constant 0 : i32
    %c0_i32_0 = arith.constant 0 : i32
    %c0_i32_1 = arith.constant 0 : i32
    %c0_i32_2 = arith.constant 0 : i32
    return %c0_i32, %c0_i32_0, %c0_i32_1 : i32, i32, i32
  }
  func.func @transform_3(%arg0: i32) -> (i32, i32) {
    %c0_i32 = arith.constant 0 : i32
    %c0_i32_0 = arith.constant 0 : i32
    %c0_i32_1 = arith.constant 0 : i32
    return %c0_i32, %c0_i32_0 : i32, i32
  }
  func.func @transform_4(%arg0: i32) -> (i32, i32) {
    %c0_i32 = arith.constant 0 : i32
    %c0_i32_0 = arith.constant 0 : i32
    return %arg0, %c0_i32 : i32, i32
  }
}

</mosaic_0001>

<bundles_post_ra>
// kernel: tpu_custom_call.1
= control target key start
LH: loop header
LB: loop body
LE: loop exit
PB: predicated region body
PF: predicated region fallthrough
CT: control target
= control target key end

     0   :  { %9 = vsyncpa [#allocation3], 0  ;;  %s1296_s0 = inlined_call_operand.vmem [shape: f32[64,16], index: 0, kind: input, shape index: {}]   ;;  %s1297_s1 = inlined_call_operand.vmem [shape: bf16[16,128], index: 1, kind: input, shape index: {}]   ;;  %s1298_s2 = inlined_call_operand.hbm [shape: bf16[3,128,128], index: 2, kind: input, shape index: {}]   ;;  %s1299_s3 = inlined_call_operand.vmem [shape: f32[4,128], index: 3, kind: input, shape index: {}]   ;;  %s1300_s4 = inlined_call_operand.hbm [shape: f32[64,128], index: 4, kind: output, shape index: {}]  }
   0x1   :  { %10 = vsyncpa [#allocation4], 0 }
   0x2   :  { %12 = vsyncpa [#allocation4 + $0x1], 0  ;;  %s1162_s15 = smov 0   ;;  %s1164_s16 = smov 0  }
   0x3   :  { %s1166_s17 = smov 0   ;;  %s1168_s18 = smov 0  }
   0x4 LB: > { %s1183_s19 = sadd.s32 4294967295, %s1129_s18   ;;  %s799_s20 = sadd.s32 4294967294, %s1129_s18   ;;  %s1129_s18 = sphi %s1168_s18, %s1308_s18   ;;  %s1125_s17 = sphi %s1166_s17, %s1307_s17   ;;  %s1121_s16 = sphi %s1164_s16, %s1306_s16   ;;  %s1117_s15 = sphi %s1162_s15, %s1305_s15  }
   0x5   : > { %s1187_s21 = sadd.s32 1, %s1129_s18   ;;  %s114_s22 = sadd.s32 1, %s1125_s17 }
   0x6   : > { %s111_s23 = ssub.s32 %s1129_s18, %s1187_s21  ;;  %p124_p0 = scmp.ne.s32.totalorder %s1125_s17, %s1121_s16 }
   0x7   : > { %p112_p1 = scmp.eq.s32.totalorder %s111_s23, 0  ;;  %p125_p2 = scmp.eq.s32.totalorder %s1183_s19, 1 }
   0x8   : > { %p130_p3 = scmp.ne.s32.totalorder %s1121_s16, %s1117_s15  ;;  %p131_p4 = scmp.eq.s32.totalorder %s799_s20, 1 }
   0x9   : > { %s1198_s24 = scalar_select %p112_p1, %s1125_s17, %s114_s22  }
   0xa   : > { %p1200_p5 = por %p125_p2, %p124_p0  ;;  %p1204_p6 = por %p131_p4, %p130_p3 }
   0xb   : > { %p800_p7 = scmp.ge.s32.totalorder %s1129_s18, 1  ;;  %p138_p8 = scmp.lt.s32.totalorder %s1129_s18, 3 }
   0xc   : > { %s1302_s26 = scalar_select %p1204_p6, 1, 0 }
   0xd   : > { %p958_p9 = scmp.eq.s32.totalorder %s1183_s19, 0  ;;  %p1211_p10 = pnand %p800_p7, %p138_p8 }
   0xe   : > { %s1131_s28 = smov [#allocation2]  }
   0xf   : > { %s153_s29 = sshll.u32 %s1131_s28, 4  ;;  %p950_p11 = pneg %p1211_p10  ;;  %s154_s29 = int_to_ptr.vmem [resolvable:$true] %s153_s29 }
  0x10   : > { %s1050_s30 = scalar_lea.vmem %s154_s29, 3072  ;;  %p1058_p3 = scmp.lt.s32.totalorder %s154_s29, %s154_s29 }
  0x11   : > { %p951_p12 = pnand %p958_p9, %p950_p11  ;;  %p1051_p0 = scmp.ne.s32.totalorder %s154_s29, %s1050_s30 }
  0x12   : > { %p1059_p4 = scmp.lt.s32.totalorder %s1050_s30, %s1050_s30 }
  0x13   : > { %p1041_p13 = pneg %p951_p12 }
  0x14   : > { %p1060_p6 = por %p1059_p4, %p1058_p3 }
  0x15   : > { %p1053_p1 = pnand %p1051_p0, %p1041_p13 }
  0x17   : > { %p1054_p2 = pneg %p1053_p1 }
  0x19   : > { %p1061_p7 = pnand %p1060_p6, %p1054_p2 }
  0x1b   : > { %1064 = shalt.err (!%p1061_p7)
}
  0x1c   : > { %s1132_s5 = smov 64   ;;  %s1133_s6 = smov 4  }
  0x1d   : > { %953 = dma.hbm_to_vmem [thread:$0]  (!%p951_p12), %s1298_s2, 3072, %s154_s29, [#allocation3], %s1132_s5, %s1132_s5, %s1133_s6  }
  0x1e   : > { %181 = sbr.rel (%p1211_p10) target bundleno = 1194 (0x4aa), region = 36 }
  0x23   : > { %1108 = dma.done.wait (%p958_p9), [#allocation3], 3072  }
  0x24   : > { %1110 = vsyncadd (%p958_p9), [#allocation3], 4294964224  ;;  %s806_s9 = sshll.u32 %s1183_s19, 2  ;;  %v998_v0 = vld [vmem:[%s1297_s1] sm:$0xff]   ;;  %vm234_vm0 = vcmask 130048   ;;  %v999_v7 = vld [vmem:[#allocation2 + $0x38] sm:$0xff]  }
  0x25   : > { %p208_p8 = scmp.lt.s32.totalorder %s806_s9, 7  ;;  %878 = vmatprep.subr.bf16.mxu0 %v998_v0  ;;  %v1000_v8 = vld [vmem:[#allocation2 + $0x30] sm:$0xff]   ;;  %884 = vmatprep.subr.bf16.mxu1 %v999_v7  ;;  %v1001_v9 = vld [vmem:[#allocation2 + $0x28] sm:$0xff]   ;;  %v1002_v10 = vld [vmem:[#allocation2 + $0x20] sm:$0xff]   ;;  %s204_s7 = sand.u32 1, %s1121_s16  }
  0x26   : > { %879 = vmatpush3.bf16.msra.mxu0 %v998_v0  ;;  %885 = vmatpush3.bf16.msra.mxu1 %v999_v7  ;;  %v1003_v11 = vld [vmem:[#allocation2 + $0x18] sm:$0xff]   ;;  %v1004_v12 = vld [vmem:[#allocation2 + $0x10] sm:$0xff]   ;;  %v1005_v13 = vld [vmem:[#allocation2 + $0x8] sm:$0xff]   ;;  %s805_s8 = sshll.u32 %s204_s7, 5  ;;  %s1256_s20 = scalar_lea.sflag [#allocation4], %s204_s7 }
  0x27   : > { %s1310_s9 = smov (!%p208_p8, %s806_s9), 7  ;;  %886 = vmatprep.subr.bf16.mxu1 %v1000_v8  ;;  %v1006_v14 = vld [vmem:[#allocation2] sm:$0xff]   ;;  %v1007_v15 = vld [vmem:[#allocation2 + $0x78] sm:$0xff]   ;;  %v1008_v16 = vld [vmem:[#allocation2 + $0x70] sm:$0xff]   ;;  %s1134_s22 = smov [#allocation5]  }
  0x28   : > { %s807_s10 = sshll.u32 %s1310_s9, 3  ;;  %904 = vmatprep.subr.bf16.mxu0 %v1007_v15  ;;  %v1009_v17 = vld [vmem:[#allocation2 + $0x68] sm:$0xff]   ;;  %v1010_v18 = vld [vmem:[#allocation2 + $0x60] sm:$0xff]   ;;  %v1011_v19 = vld [vmem:[#allocation2 + $0x58] sm:$0xff]   ;;  %s206_s9 = scalar_lea.vmem [#allocation5], %s805_s8 }
  0x29   : > { %s211_s13 = scalar_lea.vmem %s1296_s0, %s807_s10  ;;  %v808_v22 = vld [vmem:[%s1299_s3] ss:$0 sm:$0xff]  ;;  %v1012_v35 = vld [vmem:[#allocation2 + $0x50] sm:$0xff]   ;;  %v1013_v36 = vld [vmem:[#allocation2 + $0x48] sm:$0xff]   ;;  %s844_s10 = sshll.u32 %s1183_s19, 9 }
  0x2a   : > { %v215_v1 = vld [vmem:[%s211_s13] sm:$0xff]  ;;  %v216_v2 = vld [vmem:[%s211_s13 + $0x8] sm:$0xff]  ;;  %v217_v3 = vld [vmem:[%s211_s13 + $0x10] sm:$0xff]  ;;  %887 = vmatpush3.bf16.msra.mxu1 %v1000_v8  ;;  %s725_s11 = sshll.u32 %s206_s9, 4  ;;  %s1252_s14 = scalar_lea.hbm %s1300_s4, %s844_s10  ;;  %s1254_s11 = int_to_ptr.vmem [resolvable:$true] %s725_s11 }
  0x2b   : > { %v219_v4 = vpack.c.bf16 %v216_v2, %v215_v1  ;;  %v218_v5 = vld [vmem:[%s211_s13 + $0x18] sm:$0xff]  ;;  %888 = vmatprep.subr.bf16.mxu1 %v1001_v9  ;;  %v1014_v37 = vld [vmem:[#allocation2 + $0x40] sm:$0xff]   ;;  %v1016_v39 = vld [vmem:[#allocation2 + $0xb0] sm:$0xff]   ;;  %s1065_s19 = scalar_lea.vmem %s1254_s11, 512  ;;  %s1069_s23 = sshll.u32 %s1134_s22, 4  ;;  %s1070_s23 = int_to_ptr.vmem [resolvable:$false] %s1069_s23 }
  0x2c   : > { %v220_v6 = vpack.c.bf16 %v218_v5, %v217_v3  ;;  %v1015_v38 = vld [vmem:[#allocation2 + $0xb8] sm:$0xff]   ;;  %v1017_v40 = vld [vmem:[#allocation2 + $0xa8] sm:$0xff]   ;;  %v1018_v41 = vld [vmem:[#allocation2 + $0xa0] sm:$0xff]   ;;  %p1066_p6 = scmp.ne.s32.totalorder %s1254_s11, %s1065_s19  ;;  %s1071_s27 = scalar_lea.vmem %s1070_s23, 1024 }
  0x2d   : > { %880 = vmatprep.mubr.msk.bf16.mxu0 %vm234_vm0, %v219_v4  ;;  %v1019_v42 = vld [vmem:[#allocation2 + $0x98] sm:$0xff]   ;;  %v812_v45 = vld [vmem:[%s1299_s3 + $0x1] ss:$0 sm:$0xff]  ;;  %v1020_v58 = vld [vmem:[#allocation2 + $0x90] sm:$0xff]   ;;  %p1072_p11 = scmp.lt.s32.totalorder %s1254_s11, %s1070_s23  ;;  %p1073_p12 = scmp.lt.s32.totalorder %s1071_s27, %s1065_s19 }
  0x2e   : > { %881 = vmatmul.mubr.msk.bf16.vlgmr.msra.gmra.mxu0 %vm234_vm0, %v220_v6  ;;  %889 = vmatpush3.bf16.msra.mxu1 %v1001_v9  ;;  %v1021_v59 = vld [vmem:[#allocation2 + $0x88] sm:$0xff]   ;;  %v1022_v60 = vld [vmem:[#allocation2 + $0x80] sm:$0xff]   ;;  %p1067_p9 = pnand %p1066_p6, %p1200_p5 }
  0x2f   : > { %890 = vmatprep.subr.bf16.mxu1 %v1002_v10  ;;  %905 = vmatpush3.bf16.msra.mxu0 %v1007_v15  ;;  %v821_v63 = vld [vmem:[%s1299_s3 + $0x2] ss:$0 sm:$0xff]  ;;  %p1074_p13 = por %p1073_p12, %p1072_p11 }
  0x30   : > { %906 = vmatprep.subr.bf16.mxu0 %v1008_v16  ;;  %p1068_p10 = pneg %p1067_p9 }
  0x32   : > { %891 = vmatpush3.bf16.msra.mxu1 %v1002_v10  ;;  %p1075_p0 = pnand %p1074_p13, %p1068_p10 }
  0x33   : > { %892 = vmatprep.subr.bf16.mxu1 %v1003_v11  ;;  %907 = vmatpush3.bf16.msra.mxu0 %v1008_v16 }
  0x34   : > { %908 = vmatprep.subr.bf16.mxu0 %v1009_v17 }
  0x36   : > { %893 = vmatpush3.bf16.msra.mxu1 %v1003_v11 }
  0x37   : > { %894 = vmatprep.subr.bf16.mxu1 %v1004_v12  ;;  %909 = vmatpush3.bf16.msra.mxu0 %v1009_v17 }
  0x38   : > { %910 = vmatprep.subr.bf16.mxu0 %v1010_v18 }
  0x3a   : > { %895 = vmatpush3.bf16.msra.mxu1 %v1004_v12  ;;  %v664_v12 = vlaneseq }
  0x3b   : > { %896 = vmatprep.subr.bf16.mxu1 %v1005_v13  ;;  %911 = vmatpush3.bf16.msra.mxu0 %v1010_v18 }
  0x3c   : > { %912 = vmatprep.subr.bf16.mxu0 %v1011_v19 }
  0x3e   : > { %897 = vmatpush3.bf16.msra.mxu1 %v1005_v13  ;;  %v665_v13 = vand.u32 127, %v664_v12 }
  0x3f   : > { %898 = vmatprep.subr.bf16.mxu1 %v1006_v14  ;;  %913 = vmatpush3.bf16.msra.mxu0 %v1011_v19 }
  0x40   : > { %914 = vmatprep.subr.bf16.mxu0 %v1012_v35  ;;  %vm666_vm1 = vcmp.lt.s32.totalorder %v665_v13, 4 }
  0x42   : > { %899 = vmatpush3.bf16.msra.mxu1 %v1006_v14  ;;  %v830_v14 = vld [vmem:[%s1299_s3 + $0x3] ss:$0 sm:$0xff] }
  0x43   : > { %915 = vmatpush3.bf16.msra.mxu0 %v1012_v35  ;;  %924 = vmatprep.subr.bf16.mxu1 %v1015_v38 }
  0x44   : > { %916 = vmatprep.subr.bf16.mxu0 %v1013_v36 }
  0x47   : > { %917 = vmatpush3.bf16.msra.mxu0 %v1013_v36 }
  0x48   : > { %918 = vmatprep.subr.bf16.mxu0 %v1014_v37 }
  0x4b   : > { %919 = vmatpush3.bf16.msra.mxu0 %v1014_v37 }
  0xee   : > { %v882_v20 = vpop.f32.mrf.mxu0 }
  0xef   : > { %v284_v26 = vadd.f32 %v882_v20, %v808_v22 }
  0xf0   : > { %v275_v21 = vpop.f32.mrf.mxu0 }
  0xf1   : > { %v276_v24 = vadd.f32 %v808_v22, %v275_v21  ;;  %v292_v32 = vmax.f32 %v284_v26, 0.0 }
  0xf2   : > { %v883_v23 = vpop.f32.mrf.mxu0 }
  0xf3   : > { %v287_v25 = vadd.f32 %v883_v23, %v808_v22  ;;  %v290_v30 = vmax.f32 %v276_v24, 0.0 }
  0xf4   : > { %v278_v27 = vpop.f32.mrf.mxu0 }
  0xf5   : > { %v279_v28 = vadd.f32 %v808_v22, %v278_v27  ;;  %v293_v29 = vmax.f32 %v287_v25, 0.0 }
  0xf7   : > { %v291_v31 = vmax.f32 %v279_v28, 0.0  ;;  %v295_v34 = vpack.c.bf16 %v293_v29, %v292_v32 }
  0xf9   : > { %v294_v33 = vpack.c.bf16 %v291_v31, %v290_v30 }
  0xfb   : > { %900 = vmatprep.mubr.bf16.mxu1 %v294_v33 }
  0xfc   : > { %901 = vmatmul.mubr.bf16.vlgmr.msra.gmra.mxu1 %v295_v34 }
  0xfd   : > { %925 = vmatpush3.bf16.msra.mxu1 %v1015_v38 }
  0xfe   : > { %926 = vmatprep.subr.bf16.mxu1 %v1016_v39 }
 0x101   : > { %927 = vmatpush3.bf16.msra.mxu1 %v1016_v39 }
 0x102   : > { %928 = vmatprep.subr.bf16.mxu1 %v1017_v40 }
 0x105   : > { %929 = vmatpush3.bf16.msra.mxu1 %v1017_v40 }
 0x106   : > { %930 = vmatprep.subr.bf16.mxu1 %v1018_v41 }
 0x109   : > { %931 = vmatpush3.bf16.msra.mxu1 %v1018_v41 }
 0x10a   : > { %932 = vmatprep.subr.bf16.mxu1 %v1019_v42 }
 0x10d   : > { %933 = vmatpush3.bf16.msra.mxu1 %v1019_v42 }
 0x10e   : > { %934 = vmatprep.subr.bf16.mxu1 %v1020_v58 }
 0x111   : > { %935 = vmatpush3.bf16.msra.mxu1 %v1020_v58 }
 0x112   : > { %936 = vmatprep.subr.bf16.mxu1 %v1021_v59 }
 0x115   : > { %937 = vmatpush3.bf16.msra.mxu1 %v1021_v59 }
 0x116   : > { %938 = vmatprep.subr.bf16.mxu1 %v1022_v60 }
 0x119   : > { %939 = vmatpush3.bf16.msra.mxu1 %v1022_v60 }
 0x1bc   : > { %v902_v43 = vpop.f32.mrf.mxu1 }
 0x1bd   : > { %v408_v49 = vadd.f32 %v902_v43, %v812_v45 }
 0x1be   : > { %v399_v44 = vpop.f32.mrf.mxu1 }
 0x1bf   : > { %v400_v47 = vadd.f32 %v812_v45, %v399_v44  ;;  %v416_v55 = vmax.f32 %v408_v49, 0.0 }
 0x1c0   : > { %v903_v46 = vpop.f32.mrf.mxu1 }
 0x1c1   : > { %v411_v48 = vadd.f32 %v903_v46, %v812_v45  ;;  %v414_v53 = vmax.f32 %v400_v47, 0.0 }
 0x1c2   : > { %v402_v50 = vpop.f32.mrf.mxu1 }
 0x1c3   : > { %v403_v51 = vadd.f32 %v812_v45, %v402_v50  ;;  %v417_v52 = vmax.f32 %v411_v48, 0.0 }
 0x1c5   : > { %v415_v54 = vmax.f32 %v403_v51, 0.0  ;;  %v419_v57 = vpack.c.bf16 %v417_v52, %v416_v55 }
 0x1c7   : > { %v418_v56 = vpack.c.bf16 %v415_v54, %v414_v53 }
 0x1c9   : > { %920 = vmatprep.mubr.bf16.mxu0 %v418_v56 }
 0x1ca   : > { %921 = vmatmul.mubr.bf16.vlgmr.msra.gmra.mxu0 %v419_v57 }
 0x28a   : > { %v922_v61 = vpop.f32.mrf.mxu0 }
 0x28b   : > { %v533_v3 = vadd.f32 %v922_v61, %v821_v63 }
 0x28c   : > { %v524_v62 = vpop.f32.mrf.mxu0 }
 0x28d   : > { %v525_v1 = vadd.f32 %v821_v63, %v524_v62  ;;  %v541_v9 = vmax.f32 %v533_v3, 0.0 }
 0x28e   : > { %v923_v0 = vpop.f32.mrf.mxu0 }
 0x28f   : > { %v536_v2 = vadd.f32 %v923_v0, %v821_v63  ;;  %v539_v7 = vmax.f32 %v525_v1, 0.0 }
 0x290   : > { %v527_v4 = vpop.f32.mrf.mxu0 }
 0x291   : > { %v528_v5 = vadd.f32 %v821_v63, %v527_v4  ;;  %v542_v6 = vmax.f32 %v536_v2, 0.0 }
 0x293   : > { %v540_v8 = vmax.f32 %v528_v5, 0.0  ;;  %v544_v11 = vpack.c.bf16 %v542_v6, %v541_v9 }
 0x295   : > { %v543_v10 = vpack.c.bf16 %v540_v8, %v539_v7 }
 0x297   : > { %940 = vmatprep.mubr.bf16.mxu1 %v543_v10 }
 0x298   : > { %941 = vmatmul.mubr.bf16.vlgmr.msra.gmra.mxu1 %v544_v11 }
 0x358   : > { %v942_v15 = vpop.f32.mrf.mxu1 }
 0x359   : > { %v658_v16 = vadd.f32 %v942_v15, %v830_v14 }
 0x35a   : > { %v649_v17 = vpop.f32.mrf.mxu1 }
 0x35b   : > { %v650_v18 = vadd.f32 %v830_v14, %v649_v17  ;;  %v669_v19 = vsel %vm666_vm1, %v658_v16, -1e+30 }
 0x35c   : > { %675 = vmax.xlane.f32.xlu1 %v669_v19  ;;  %v943_v20 = vpop.f32.mrf.mxu1 }
 0x35d   : > { %v661_v21 = vadd.f32 %v943_v20, %v830_v14  ;;  %v667_v22 = vsel %vm666_vm1, %v650_v18, -1e+30 }
 0x35e   : > { %v652_v23 = vpop.f32.mrf.mxu1  ;;  %671 = vmax.xlane.f32.xlu0 %v667_v22 }
 0x35f   : > { %v653_v24 = vadd.f32 %v830_v14, %v652_v23  ;;  %v670_v25 = vsel %vm666_vm1, %v661_v21, -1e+30 }
 0x360   : > { %677 = vmax.xlane.f32.xlu1 %v670_v25 }
 0x361   : > { %v668_v26 = vsel %vm666_vm1, %v653_v24, -1e+30 }
 0x362   : > { %673 = vmax.xlane.f32.xlu0 %v668_v26 }
 0x3e5   : > { %v676_v27 = vpop.xlane.xlu1 %675 }
 0x3e6   : > { %v681_v28 = vsub.f32 %v669_v19, %v676_v27 }
 0x3e7   : > { %v672_v29 = vpop.xlane.xlu0 %671 }
 0x3e8   : > { %v679_v30 = vsub.f32 %v667_v22, %v672_v29  ;;  %v687_v33 = vmul.f32 1.442695, %v681_v28 }
 0x3e9   : > { %v678_v31 = vpop.xlane.xlu1 %677 }
 0x3ea   : > { %v683_v32 = vmul.f32 1.442695, %v679_v30  ;;  %v682_v35 = vsub.f32 %v670_v25, %v678_v31 }
 0x3eb   : > { %v674_v34 = vpop.xlane.xlu0 %673 }
 0x3ec   : > { %1023 = vpow2.f32 %v683_v32  ;;  %v680_v36 = vsub.f32 %v668_v26, %v674_v34  ;;  %v689_v38 = vmul.f32 1.442695, %v682_v35 }
 0x3ed   : > { %1025 = vpow2.f32 %v687_v33 }
 0x3ee   : > { %v685_v37 = vmul.f32 1.442695, %v680_v36 }
 0x3f0   : > { %1027 = vpow2.f32 %v685_v37 }
 0x3f1   : > { %1029 = vpow2.f32 %v689_v38 }
 0x3f9   : > { %v1024_v39 = vpop.eup %1023 }
 0x3fa   : > { %691 = vadd.xlane.f32.xlu0 %v1024_v39  ;;  %v1026_v40 = vpop.eup %1025 }
 0x3fd   : > { %v1028_v41 = vpop.eup %1027 }
 0x3fe   : > { %695 = vadd.xlane.f32.xlu0 %v1026_v40  ;;  %693 = vadd.xlane.f32.xlu1 %v1028_v41  ;;  %v1030_v42 = vpop.eup %1029 }
 0x402   : > { %697 = vadd.xlane.f32.xlu1 %v1030_v42 }
 0x483   : > { %v692_v43 = vpop.xlane.xlu0 %691 }
 0x484   : > { %1031 = vrcp.f32 %v692_v43 }
 0x487   : > { %v694_v44 = vpop.xlane.xlu1 %693  ;;  %v696_v45 = vpop.xlane.xlu0 %695 }
 0x488   : > { %1033 = vrcp.f32 %v694_v44 }
 0x489   : > { %1035 = vrcp.f32 %v696_v45 }
 0x48b   : > { %v698_v46 = vpop.xlane.xlu1 %697 }
 0x48c   : > { %1037 = vrcp.f32 %v698_v46 }
 0x491   : > { %v1032_v47 = vpop.eup %1031 }
 0x492   : > { %v700_v48 = vmul.f32 %v1032_v47, %v1024_v39 }
 0x494   : > { %707 = vst [vmem:[%s206_s9] sm:$0xff] %v700_v48 }
 0x495   : > { %v1034_v49 = vpop.eup %1033 }
 0x496   : > { %v1036_v50 = vpop.eup %1035  ;;  %v702_v51 = vmul.f32 %v1034_v49, %v1028_v41 }
 0x497   : > { %v704_v52 = vmul.f32 %v1036_v50, %v1026_v40 }
 0x498   : > { %708 = vst [vmem:[%s206_s9 + $0x8] sm:$0xff] %v702_v51 }
 0x499   : > { %v1038_v53 = vpop.eup %1037  ;;  %709 = vst [vmem:[%s206_s9 + $0x10] sm:$0xff] %v704_v52 }
 0x49a   : > { %v706_v54 = vmul.f32 %v1038_v53, %v1030_v42 }
 0x49c   : > { %710 = vst [vmem:[%s206_s9 + $0x18] sm:$0xff] %v706_v54 }
 0x49d   : > { %1078 = shalt.err (!%p1075_p0)
}
 0x49e   : > { %s1079_s28 = scalar_lea.hbm %s1252_s14, 512  ;;  %s1083_s5 = scalar_lea.hbm %s1300_s4, 1024 }
 0x49f   : > { %p1080_p1 = scmp.ne.s32.totalorder %s1252_s14, %s1079_s28  ;;  %p1084_p4 = scmp.lt.s32.totalorder %s1252_s14, %s1300_s4 }
 0x4a0   : > { %p1085_p7 = scmp.lt.s32.totalorder %s1083_s5, %s1079_s28 }
 0x4a1   : > { %p1081_p2 = pnand %p1080_p1, %p1200_p5 }
 0x4a2   : > { %p1086_p8 = por %p1085_p7, %p1084_p4 }
 0x4a3   : > { %p1082_p3 = pneg %p1081_p2 }
 0x4a5   : > { %p1087_p6 = pnand %p1086_p8, %p1082_p3 }
 0x4a7   : > { %1090 = shalt.err (!%p1087_p6)
}
 0x4a8   : > { %s1135_s8 = smov 128   ;;  %s1136_s9 = smov 8  }
 0x4a9   : > { %948 = dma.vmem_to_hbm [thread:$0]  (%p1200_p5), %s1254_s11, 512, %s1252_s14, %s1256_s20, %s1135_s8, %s1135_s8, %s1136_s9  }
 0x4aa PF: > { %p960_p9 = scmp.ge.s32.totalorder %s1129_s18, 2  ;;  %s740_s10 = sand.u32 1, %s1117_s15  }
 0x4ab   : > { %p1304_p10 = scmp.ne.s32.totalorder %s1302_s26, 0  ;;  %s741_s12 = scalar_lea.sflag [#allocation4], %s740_s10 }
 0x4ad   : > { %p955_p11 = pnand %p960_p9, %p1304_p10 }
 0x4af   : > { %p956_p12 = pneg %p955_p11 }
 0x4b1   : > { %1112 = dma.done.wait (%p956_p12), %s741_s12, 512  }
 0x4b2   : > { %1114 = vsyncadd (%p956_p12), %s741_s12, 4294966784  ;;  %p15_p13 = scmp.ge.s32.totalorder %s1187_s21, 4   ;;  %s1305_s15 = smov %s1121_s16 }
 0x4b3   : > { %s1306_s16 = smov %s1125_s17  ;;  %s1307_s17 = smov %s1198_s24 }
 0x4b4   : > { %s1308_s18 = smov %s1187_s21  ;;  %17 = sbr.rel (!%p15_p13) target bundleno = 4 (0x4), region = 78 }
 0x4b9   :  { %746 = vsyncpa [#allocation3], 1 }
 0x4ba   :  { %748 = vsyncpa [#allocation3 + $0x1], 1 }
 0x4bb   :  { %749 = vsyncpa [#allocation4], 1 }
 0x4bc   :  { %751 = vsyncpa [#allocation4 + $0x1], 1 }

</bundles_post_ra>
